<compile_context>
chip_gen: v6e
topology: v6e:2x2x1
jax: 0.10.0
libtpu: 0.0.40
codegen_flags: <defaults>
</compile_context>

<pallas_src>
import numpy as np
import jax
import jax.numpy as jnp
from jax import lax
from jax.experimental import pallas as pl
from jax.experimental.pallas import tpu as pltpu


# ----------------------------- Pallas kernel ------------------------------ #
def output_encoder_kernel(x_ref, t1_ref, b1_ref, t2_ref, b2_ref,
                          w3_ref, b3_ref, w4_ref, b4_ref, o_ref):
    x = x_ref[...]                                                   # (7, TB) feature-major

    # Conv1d(1->8, k=3, same) + ReLU + MaxPool1d(2): one stacked even/odd Toeplitz matmul,
    # then a sublane-aligned half/half maximum implements the pool.
    y1 = jnp.maximum(
        jnp.dot(t1_ref[...], x, preferred_element_type=jnp.float32) + b1_ref[...], 0.0)
    p = jnp.maximum(y1[:24], y1[24:])                                # (24, TB), row = s*8 + c

    # Conv1d(8->32, k=3, same) + ReLU + MaxPool1d(2), same trick with K=24.
    y2 = jnp.maximum(
        jnp.dot(t2_ref[...], p, preferred_element_type=jnp.float32) + b2_ref[...], 0.0)
    q = jnp.maximum(y2[:32], y2[32:])                                # (32, TB) == Flatten^T

    # Linear(32->16) + ReLU
    h = jnp.maximum(
        jnp.dot(w3_ref[...], q, preferred_element_type=jnp.float32) + b3_ref[...], 0.0)

    # Linear(16->11)
    o_ref[...] = jnp.dot(w4_ref[...], h, preferred_element_type=jnp.float32) + b4_ref[...]


# -------------------- host-side weight pre-lowering (run once) -------------------- #
def _conv1_toeplitz_eo(w1):
    """(8,1,3) conv1 weights -> (T1e, T1o), each (24, 7).
    Row index = s*8 + c (pooled position s in {0,1,2}, channel c); even half covers conv
    positions {0,2,4}, odd half {1,3,5}; conv position 6 (dropped by the pool) is never built."""
    w1 = np.asarray(w1, np.float32)
    Te = np.zeros((24, 7), np.float32)
    To = np.zeros((24, 7), np.float32)
    for s in range(3):
        for c in range(8):
            for k in range(3):
                je = 2 * s + k - 1          # padding='same' (pad 1)
                jo = 2 * s + 1 + k - 1
                if 0 <= je < 7:
                    Te[s * 8 + c, je] = w1[c, 0, k]
                if 0 <= jo < 7:
                    To[s * 8 + c, jo] = w1[c, 0, k]
    return Te, To


def _conv2_toeplitz_eo(w2):
    """(32,8,3) conv2 weights -> (T2e, T2o), each (32, 24).
    Column index = s*8 + ci (pooled position s, input channel ci); even half = conv output
    position 0, odd half = position 1; position 2 (dropped by the pool) is never built."""
    w2 = np.asarray(w2, np.float32)
    Te = np.zeros((32, 24), np.float32)
    To = np.zeros((32, 24), np.float32)
    for c in range(32):
        for ci in range(8):
            for k in range(3):
                se = 0 + k - 1              # output position 0
                so = 1 + k - 1              # output position 1
                if 0 <= se < 3:
                    Te[c, se * 8 + ci] = w2[c, ci, k]
                if 0 <= so < 3:
                    To[c, so * 8 + ci] = w2[c, ci, k]
    return Te, To


def prepare_output_encoder(params):
    """Pre-lower PyTorch-layout params to kernel-ready constants.  Call ONCE and reuse."""
    w1, b1, w2, b2, w3, b3, w4, b4 = params
    t1e, t1o = _conv1_toeplitz_eo(w1)
    t2e, t2o = _conv2_toeplitz_eo(w2)
    t1 = np.concatenate([t1e, t1o], axis=0)                          # (48, 7)
    t2 = np.concatenate([t2e, t2o], axis=0)                          # (64, 24)
    b1col = np.tile(np.asarray(b1, np.float32), 6).reshape(48, 1)    # row (h*24 + s*8 + c) -> b1[c]
    b2col = np.tile(np.asarray(b2, np.float32), 2).reshape(64, 1)
    b3col = np.asarray(b3, np.float32).reshape(16, 1)
    b4col = np.asarray(b4, np.float32).reshape(11, 1)
    consts = (t1, b1col, t2, b2col,
              np.asarray(w3, np.float32), b3col,
              np.asarray(w4, np.float32), b4col)
    return tuple(jnp.asarray(c) for c in consts)


# ----------------------------- wrapper ------------------------------ #
def _round_up(n, m):
    return ((n + m - 1) // m) * m


def output_encoder_pallas(x, prepared, *, tile_b=1024):
    """x: (..., 7) float -> (B, 11) float32, B = prod(leading dims)."""
    consts = prepared

    xf = jnp.asarray(x, jnp.float32).reshape(-1, 7)
    B = xf.shape[0]
    TILE_B = min(tile_b, _round_up(max(B, 1), 128))        # lane-dense batch tile
    Bp = _round_up(B, TILE_B)

    xT = xf.T                                              # (7, B) feature-major
    if Bp != B:
        xT = jnp.pad(xT, ((0, 0), (0, Bp - B)))

    def const_spec(a):
        # Full-array block, constant index -> stays resident in VMEM across grid steps.
        return pl.BlockSpec(a.shape, lambda i: (0, 0))

    out_t = pl.pallas_call(
        output_encoder_kernel,
        out_shape=jax.ShapeDtypeStruct((11, Bp), jnp.float32),
        grid=(Bp // TILE_B,),
        in_specs=[pl.BlockSpec((7, TILE_B), lambda i: (0, i))]
                 + [const_spec(a) for a in consts],
        out_specs=pl.BlockSpec((11, TILE_B), lambda i: (0, i)),
        compiler_params=pltpu.CompilerParams(
            dimension_semantics=("parallel",)),            # 2 TCs on v7x; no-op on v5e/v6e
    )(xT, *consts)

    return out_t[:, :B].T                                  # (B, 11)


# ----------------------------- pure-JAX reference -------------------------- #
def output_encoder_ref(x, params):
    w1, b1, w2, b2, w3, b3, w4, b4 = params
    x = jnp.asarray(x, jnp.float32).reshape(-1, 7)
    B = x.shape[0]
    xin = x.reshape(B, 1, 7)
    dn = ('NCH', 'OIH', 'NCH')
    y1 = lax.conv_general_dilated(xin, w1, (1,), [(1, 1)], dimension_numbers=dn)
    y1 = jnp.maximum(y1 + b1[None, :, None], 0.0)                     # (B, 8, 7)
    p1 = jnp.max(y1[:, :, :6].reshape(B, 8, 3, 2), axis=-1)           # (B, 8, 3)
    y2 = lax.conv_general_dilated(p1, w2, (1,), [(1, 1)], dimension_numbers=dn)
    y2 = jnp.maximum(y2 + b2[None, :, None], 0.0)                     # (B, 32, 3)
    p2 = jnp.max(y2[:, :, :2].reshape(B, 32, 1, 2), axis=-1)          # (B, 32, 1)
    flat = p2.reshape(B, 32)
    h = jnp.maximum(flat @ w3.T + b3[None, :], 0.0)
    return h @ w4.T + b4[None, :]


# --------------------------------- main ------------------------------------ #
if __name__ == "__main__":
    key = jax.random.PRNGKey(0)
    kx, k1, k2, k3, k4, k5, k6, k7, k8 = jax.random.split(key, 9)

    # Deterministic synthetic parameters (shapes from the nn.Module __init__)
    w1 = 0.2 * jax.random.normal(k1, (8, 1, 3), dtype=jnp.float32)    # Conv1d(1, 8, 3)
    b1 = 0.1 * jax.random.normal(k2, (8,), dtype=jnp.float32)
    w2 = 0.2 * jax.random.normal(k3, (32, 8, 3), dtype=jnp.float32)   # Conv1d(8, 32, 3)
    b2 = 0.1 * jax.random.normal(k4, (32,), dtype=jnp.float32)
    w3 = 0.2 * jax.random.normal(k5, (16, 32), dtype=jnp.float32)     # Linear(32, 16)
    b3 = 0.1 * jax.random.normal(k6, (16,), dtype=jnp.float32)
    w4 = 0.2 * jax.random.normal(k7, (11, 16), dtype=jnp.float32)     # Linear(16, 11)
    b4 = 0.1 * jax.random.normal(k8, (11,), dtype=jnp.float32)
    params = (w1, b1, w2, b2, w3, b3, w4, b4)

    prepared = prepare_output_encoder(params)                         # host pre-lowering, once

    # Small-batch check (single grid step)
    B = 8
    x = jax.random.normal(kx, (B, 7), dtype=jnp.float32)              # forward reshapes to (-1,1,7)
    out = jax.block_until_ready(output_encoder_pallas(x, prepared))
    ref = jax.block_until_ready(output_encoder_ref(x, params))
    assert out.shape == (B, 11), out.shape
    np.testing.assert_allclose(np.asarray(out), np.asarray(ref), rtol=1e-4, atol=1e-4)

    # Multi-grid-step check (exercises batch tiling + padding path)
    B2 = 300
    x2 = jax.random.normal(kx, (B2, 7), dtype=jnp.float32)
    out2 = jax.block_until_ready(output_encoder_pallas(x2, prepared, tile_b=128))
    ref2 = jax.block_until_ready(output_encoder_ref(x2, params))
    assert out2.shape == (B2, 11), out2.shape
    np.testing.assert_allclose(np.asarray(out2), np.asarray(ref2), rtol=1e-4, atol=1e-4)

    # Larger-batch check (default tile, non-multiple of 128)
    B3 = 1500
    x3 = jax.random.normal(kx, (B3, 7), dtype=jnp.float32)
    out3 = jax.block_until_ready(output_encoder_pallas(x3, prepared))
    ref3 = jax.block_until_ready(output_encoder_ref(x3, params))
    np.testing.assert_allclose(np.asarray(out3), np.asarray(ref3), rtol=1e-4, atol=1e-4)

    print("KERNEL_OK")
</pallas_src>

<mosaic_0001>
module attributes {stable_mosaic.version = 11 : i64} {
  func.func @output_encoder_kernel(%arg0: i32, %arg1: memref<7x128xf32, #tpu.memory_space<vmem>>, %arg2: memref<48x7xf32, #tpu.memory_space<vmem>>, %arg3: memref<48x1xf32, #tpu.memory_space<vmem>>, %arg4: memref<64x24xf32, #tpu.memory_space<vmem>>, %arg5: memref<64x1xf32, #tpu.memory_space<vmem>>, %arg6: memref<16x32xf32, #tpu.memory_space<vmem>>, %arg7: memref<16x1xf32, #tpu.memory_space<vmem>>, %arg8: memref<11x16xf32, #tpu.memory_space<vmem>>, %arg9: memref<11x1xf32, #tpu.memory_space<vmem>>, %arg10: memref<11x128xf32, #tpu.memory_space<vmem>>) attributes {dimension_semantics = [#tpu.dimension_semantics<parallel>], iteration_bounds = array<i64: 1>, scalar_prefetch = 0 : i64, scratch_operands = 0 : i64, tpu.core_type = #tpu.core_type<tc>, window_params = [{transform_indices = @transform_0, window_bounds = array<i64: 7, 128>}, {pipeline_mode = #tpu.pipeline_mode<synchronous>, transform_indices = @transform_1, window_bounds = array<i64: 48, 7>}, {pipeline_mode = #tpu.pipeline_mode<synchronous>, transform_indices = @transform_2, window_bounds = array<i64: 48, 1>}, {pipeline_mode = #tpu.pipeline_mode<synchronous>, transform_indices = @transform_3, window_bounds = array<i64: 64, 24>}, {pipeline_mode = #tpu.pipeline_mode<synchronous>, transform_indices = @transform_4, window_bounds = array<i64: 64, 1>}, {pipeline_mode = #tpu.pipeline_mode<synchronous>, transform_indices = @transform_5, window_bounds = array<i64: 16, 32>}, {pipeline_mode = #tpu.pipeline_mode<synchronous>, transform_indices = @transform_6, window_bounds = array<i64: 16, 1>}, {pipeline_mode = #tpu.pipeline_mode<synchronous>, transform_indices = @transform_7, window_bounds = array<i64: 11, 16>}, {pipeline_mode = #tpu.pipeline_mode<synchronous>, transform_indices = @transform_8, window_bounds = array<i64: 11, 1>}, {transform_indices = @transform_9, window_bounds = array<i64: 11, 128>}]} {
    %c0 = arith.constant 0 : index
    %c0_0 = arith.constant 0 : index
    %0 = vector.load %arg1[%c0, %c0_0] : memref<7x128xf32, #tpu.memory_space<vmem>>, vector<7x128xf32>
    %c0_1 = arith.constant 0 : index
    %c0_2 = arith.constant 0 : index
    %1 = vector.load %arg2[%c0_1, %c0_2] : memref<48x7xf32, #tpu.memory_space<vmem>>, vector<48x7xf32>
    %cst = arith.constant dense<0.000000e+00> : vector<48x128xf32>
    %2 = tpu.matmul %1, %0, %cst {dimension_numbers = #tpu.dot_dimension_numbers<[1], [0], [0], [1], [0, 0, 1, 1], [], []>} : vector<48x7xf32>, vector<7x128xf32>, vector<48x128xf32> -> vector<48x128xf32>
    %c0_3 = arith.constant 0 : index
    %c0_4 = arith.constant 0 : index
    %3 = vector.load %arg3[%c0_3, %c0_4] : memref<48x1xf32, #tpu.memory_space<vmem>>, vector<48x1xf32>
    %4 = vector.broadcast %3 : vector<48x1xf32> to vector<48x128xf32>
    %5 = arith.addf %2, %4 : vector<48x128xf32>
    %cst_5 = arith.constant 0.000000e+00 : f32
    %6 = vector.broadcast %cst_5 : f32 to vector<48x128xf32>
    %7 = arith.maximumf %5, %6 : vector<48x128xf32>
    %8 = vector.extract_strided_slice %7 {offsets = [0, 0], sizes = [24, 128], strides = [1, 1]} : vector<48x128xf32> to vector<24x128xf32>
    %9 = vector.extract_strided_slice %7 {offsets = [24, 0], sizes = [24, 128], strides = [1, 1]} : vector<48x128xf32> to vector<24x128xf32>
    %10 = arith.maximumf %8, %9 : vector<24x128xf32>
    %c0_6 = arith.constant 0 : index
    %c0_7 = arith.constant 0 : index
    %11 = vector.load %arg4[%c0_6, %c0_7] : memref<64x24xf32, #tpu.memory_space<vmem>>, vector<64x24xf32>
    %cst_8 = arith.constant dense<0.000000e+00> : vector<64x128xf32>
    %12 = tpu.matmul %11, %10, %cst_8 {dimension_numbers = #tpu.dot_dimension_numbers<[1], [0], [0], [1], [0, 0, 1, 1], [], []>} : vector<64x24xf32>, vector<24x128xf32>, vector<64x128xf32> -> vector<64x128xf32>
    %c0_9 = arith.constant 0 : index
    %c0_10 = arith.constant 0 : index
    %13 = vector.load %arg5[%c0_9, %c0_10] : memref<64x1xf32, #tpu.memory_space<vmem>>, vector<64x1xf32>
    %14 = vector.broadcast %13 : vector<64x1xf32> to vector<64x128xf32>
    %15 = arith.addf %12, %14 : vector<64x128xf32>
    %cst_11 = arith.constant 0.000000e+00 : f32
    %16 = vector.broadcast %cst_11 : f32 to vector<64x128xf32>
    %17 = arith.maximumf %15, %16 : vector<64x128xf32>
    %18 = vector.extract_strided_slice %17 {offsets = [0, 0], sizes = [32, 128], strides = [1, 1]} : vector<64x128xf32> to vector<32x128xf32>
    %19 = vector.extract_strided_slice %17 {offsets = [32, 0], sizes = [32, 128], strides = [1, 1]} : vector<64x128xf32> to vector<32x128xf32>
    %20 = arith.maximumf %18, %19 : vector<32x128xf32>
    %c0_12 = arith.constant 0 : index
    %c0_13 = arith.constant 0 : index
    %21 = vector.load %arg6[%c0_12, %c0_13] : memref<16x32xf32, #tpu.memory_space<vmem>>, vector<16x32xf32>
    %cst_14 = arith.constant dense<0.000000e+00> : vector<16x128xf32>
    %22 = tpu.matmul %21, %20, %cst_14 {dimension_numbers = #tpu.dot_dimension_numbers<[1], [0], [0], [1], [0, 0, 1, 1], [], []>} : vector<16x32xf32>, vector<32x128xf32>, vector<16x128xf32> -> vector<16x128xf32>
    %c0_15 = arith.constant 0 : index
    %c0_16 = arith.constant 0 : index
    %23 = vector.load %arg7[%c0_15, %c0_16] : memref<16x1xf32, #tpu.memory_space<vmem>>, vector<16x1xf32>
    %24 = vector.broadcast %23 : vector<16x1xf32> to vector<16x128xf32>
    %25 = arith.addf %22, %24 : vector<16x128xf32>
    %cst_17 = arith.constant 0.000000e+00 : f32
    %26 = vector.broadcast %cst_17 : f32 to vector<16x128xf32>
    %27 = arith.maximumf %25, %26 : vector<16x128xf32>
    %c0_18 = arith.constant 0 : index
    %c0_19 = arith.constant 0 : index
    %28 = vector.load %arg8[%c0_18, %c0_19] : memref<11x16xf32, #tpu.memory_space<vmem>>, vector<11x16xf32>
    %cst_20 = arith.constant dense<0.000000e+00> : vector<11x128xf32>
    %29 = tpu.matmul %28, %27, %cst_20 {dimension_numbers = #tpu.dot_dimension_numbers<[1], [0], [0], [1], [0, 0, 1, 1], [], []>} : vector<11x16xf32>, vector<16x128xf32>, vector<11x128xf32> -> vector<11x128xf32>
    %c0_21 = arith.constant 0 : index
    %c0_22 = arith.constant 0 : index
    %30 = vector.load %arg9[%c0_21, %c0_22] : memref<11x1xf32, #tpu.memory_space<vmem>>, vector<11x1xf32>
    %31 = vector.broadcast %30 : vector<11x1xf32> to vector<11x128xf32>
    %32 = arith.addf %29, %31 : vector<11x128xf32>
    %c0_23 = arith.constant 0 : index
    %c0_24 = arith.constant 0 : index
    %33 = vector.load %arg10[%c0_23, %c0_24] : memref<11x128xf32, #tpu.memory_space<vmem>>, vector<11x128xf32>
    tpu.vector_store %arg10[%c0_23, %c0_24], %32 {strides = array<i32>} : memref<11x128xf32, #tpu.memory_space<vmem>>, vector<11x128xf32>,
    return
  }
  func.func @transform_0(%arg0: i32) -> (i32, i32) {
    %c0_i32 = arith.constant 0 : i32
    %c0_i32_0 = arith.constant 0 : i32
    return %c0_i32, %arg0 : i32, i32
  }
  func.func @transform_1(%arg0: i32) -> (i32, i32) {
    %c0_i32 = arith.constant 0 : i32
    %c0_i32_0 = arith.constant 0 : i32
    %c0_i32_1 = arith.constant 0 : i32
    return %c0_i32, %c0_i32_0 : i32, i32
  }
  func.func @transform_2(%arg0: i32) -> (i32, i32) {
    %c0_i32 = arith.constant 0 : i32
    %c0_i32_0 = arith.constant 0 : i32
    %c0_i32_1 = arith.constant 0 : i32
    return %c0_i32, %c0_i32_0 : i32, i32
  }
  func.func @transform_3(%arg0: i32) -> (i32, i32) {
    %c0_i32 = arith.constant 0 : i32
    %c0_i32_0 = arith.constant 0 : i32
    %c0_i32_1 = arith.constant 0 : i32
    return %c0_i32, %c0_i32_0 : i32, i32
  }
  func.func @transform_4(%arg0: i32) -> (i32, i32) {
    %c0_i32 = arith.constant 0 : i32
    %c0_i32_0 = arith.constant 0 : i32
    %c0_i32_1 = arith.constant 0 : i32
    return %c0_i32, %c0_i32_0 : i32, i32
  }
  func.func @transform_5(%arg0: i32) -> (i32, i32) {
    %c0_i32 = arith.constant 0 : i32
    %c0_i32_0 = arith.constant 0 : i32
    %c0_i32_1 = arith.constant 0 : i32
    return %c0_i32, %c0_i32_0 : i32, i32
  }
  func.func @transform_6(%arg0: i32) -> (i32, i32) {
    %c0_i32 = arith.constant 0 : i32
    %c0_i32_0 = arith.constant 0 : i32
    %c0_i32_1 = arith.constant 0 : i32
    return %c0_i32, %c0_i32_0 : i32, i32
  }
  func.func @transform_7(%arg0: i32) -> (i32, i32) {
    %c0_i32 = arith.constant 0 : i32
    %c0_i32_0 = arith.constant 0 : i32
    %c0_i32_1 = arith.constant 0 : i32
    return %c0_i32, %c0_i32_0 : i32, i32
  }
  func.func @transform_8(%arg0: i32) -> (i32, i32) {
    %c0_i32 = arith.constant 0 : i32
    %c0_i32_0 = arith.constant 0 : i32
    %c0_i32_1 = arith.constant 0 : i32
    return %c0_i32, %c0_i32_0 : i32, i32
  }
  func.func @transform_9(%arg0: i32) -> (i32, i32) {
    %c0_i32 = arith.constant 0 : i32
    %c0_i32_0 = arith.constant 0 : i32
    return %c0_i32, %arg0 : i32, i32
  }
}

</mosaic_0001>

<bundles_post_ra>
// kernel: tpu_custom_call.1
= control target key start
LH: loop header
LB: loop body
LE: loop exit
PB: predicated region body
PF: predicated region fallthrough
CT: control target
= control target key end

     0   :  { %vm95_vm0 = vcmask 1046528   ;;  %vm76_vm1 = vcmask 56320   ;;  %v735_v4 = vmov 0   ;;  %s919_s0 = inlined_call_operand.vmem [shape: f32[7,128], index: 0, kind: input, shape index: {}]   ;;  %s920_s1 = inlined_call_operand.vmem [shape: f32[48,7], index: 1, kind: input, shape index: {}]   ;;  %s921_s2 = inlined_call_operand.vmem [shape: f32[48,1], index: 2, kind: input, shape index: {}]   ;;  %s922_s3 = inlined_call_operand.vmem [shape: f32[64,24], index: 3, kind: input, shape index: {}]   ;;  %s923_s4 = inlined_call_operand.vmem [shape: f32[64,1], index: 4, kind: input, shape index: {}]   ;;  %s924_s5 = inlined_call_operand.vmem [shape: f32[16,32], index: 5, kind: input, shape index: {}]   ;;  %s925_s6 = inlined_call_operand.vmem [shape: f32[16,1], index: 6, kind: input, shape index: {}]   ;;  %s926_s7 = inlined_call_operand.vmem [shape: f32[11,16], index: 7, kind: input, shape index: {}]   ;;  %s927_s8 = inlined_call_operand.vmem [shape: f32[11,1], index: 8, kind: input, shape index: {}]   ;;  %s928_s9 = inlined_call_operand.hbm [shape: f32[11,128], index: 9, kind: output, shape index: {}]  }
   0x1   :  { %v33_v0 = vld [vmem:[%s919_s0] sm:$0x7f]  ;;  %v35_v2 = vld [vmem:[%s920_s1 + $0x8] sm:$0xff]  ;;  %v36_v3 = vld [vmem:[%s920_s1 + $0x10] sm:$0xff]  ;;  %712 = vset.pattern.permute.xlu1 %v735_v4  ;;  %711 = vset.pattern.permute.xlu0 %v735_v4 }
   0x2   :  { %v34_v1 = vld [vmem:[%s920_s1] sm:$0xff]  ;;  %660 = vmatprep.subr.msk.mxu0 %vm95_vm0, %v33_v0  ;;  %v42_v5 = vld [vmem:[%s921_s2 + $0x10] sm:$0xff]  ;;  %v41_v6 = vld [vmem:[%s921_s2 + $0x8] sm:$0xff] }
   0x3   :  { %662 = vmatprep.mubr.msk.f32.mxu0 %vm76_vm1, %v34_v1  ;;  %661 = vmatpush3.msk.msra.mxu0 %vm95_vm0, %v33_v0  ;;  %v37_v7 = vld [vmem:[%s920_s1 + $0x18] sm:$0xff]  ;;  %v38_v8 = vld [vmem:[%s920_s1 + $0x20] sm:$0xff]  ;;  %v45_v9 = vld [vmem:[%s921_s2 + $0x28] sm:$0xff] }
   0x4   :  { %663 = vmatmul.mubr.msk.f32.vlgmr.msra.gmra.mxu0 %vm76_vm1, %v35_v2  ;;  %58 = vperm.xlu0 %711, %v42_v5   ;;  %v44_v10 = vld [vmem:[%s921_s2 + $0x20] sm:$0xff]  ;;  %v39_v11 = vld [vmem:[%s920_s1 + $0x28] sm:$0xff] }
   0x5   :  { %665 = vmatprep.mubr.msk.f32.mxu0 %vm76_vm1, %v36_v3  ;;  %53 = vperm.xlu1 %712, %v41_v6  }
   0x8   :  { %666 = vmatmul.mubr.msk.f32.gmra.mxu0 %vm76_vm1, %v37_v7  ;;  %73 = vperm.xlu0 %711, %v45_v9  }
   0x9   :  { %668 = vmatprep.mubr.msk.f32.mxu0 %vm76_vm1, %v38_v8 }
   0xa   :  { %14 = vsyncpa [#allocation3], 0  ;;  %68 = vperm.xlu1 %712, %v44_v10   ;;  %v40_v12 = vld [vmem:[%s921_s2] sm:$0xff]  ;;  %v43_v13 = vld [vmem:[%s921_s2 + $0x18] sm:$0xff]  ;;  %vm259_vm2 = vcmask 195584   ;;  %vm415_vm3 = vcmask 261120  }
   0xb   :  { %v214_v14 = vld [vmem:[%s923_s4 + $0x18] sm:$0xff]  ;;  %v213_v16 = vld [vmem:[%s923_s4 + $0x10] sm:$0xff]  ;;  %v212_v18 = vld [vmem:[%s923_s4 + $0x8] sm:$0xff]  ;;  %vm513_vm4 = vcmask 130048   ;;  %s736_s29 = smov [#allocation2]  }
   0xc   :  { %669 = vmatmul.mubr.msk.f32.gmra.mxu0 %vm76_vm1, %v39_v11  ;;  %48 = vperm.xlu0 %711, %v40_v12   ;;  %v218_v15 = vld [vmem:[%s923_s4 + $0x38] sm:$0xff]  ;;  %v217_v17 = vld [vmem:[%s923_s4 + $0x30] sm:$0xff]  ;;  %v216_v19 = vld [vmem:[%s923_s4 + $0x28] sm:$0xff]  ;;  %s602_s30 = sshll.u32 %s736_s29, 4  ;;  %s603_s30 = int_to_ptr.vmem [resolvable:$true] %s602_s30 }
   0xd   :  { %v211_v20 = vld [vmem:[%s923_s4] sm:$0xff]  ;;  %v404_v22 = vld [vmem:[%s925_s6 + $0x8] sm:$0xff]  ;;  %v205_v55 = vld [vmem:[%s922_s3 + $0x10] sm:$0xff]  ;;  %s713_s10 = scalar_lea.vmem %s603_s30, 256  ;;  %p718_p1 = scmp.lt.s32.totalorder %s603_s30, %s603_s30 }
   0xe   :  { %63 = vperm.xlu1 %712, %v43_v13   ;;  %v215_v21 = vld [vmem:[%s923_s4 + $0x20] sm:$0xff]  ;;  %v502_v25 = vld [vmem:[%s927_s8 + $0x8] sm:$0x7]  ;;  %v206_v56 = vld [vmem:[%s922_s3 + $0x18] sm:$0xff]  ;;  %p714_p0 = scmp.ne.s32.totalorder %s603_s30, %s713_s10  ;;  %p719_p2 = scmp.lt.s32.totalorder %s713_s10, %s713_s10 }
   0xf   :  { %v403_v23 = vld [vmem:[%s925_s6] sm:$0xff]  ;;  %v204_v54 = vld [vmem:[%s922_s3 + $0x8] sm:$0xff]  ;;  %v209_v59 = vld [vmem:[%s922_s3 + $0x30] sm:$0xff] }
  0x10   :  { %236 = vperm.xlu0 %711, %v214_v14   ;;  %v501_v24 = vld [vmem:[%s927_s8] sm:$0xff]  ;;  %v208_v58 = vld [vmem:[%s922_s3 + $0x28] sm:$0xff]  ;;  %v210_v60 = vld [vmem:[%s922_s3 + $0x38] sm:$0xff]  ;;  %p720_p3 = por %p719_p2, %p718_p1 }
  0x11   :  { %v203_v26 = vld [vmem:[%s922_s3] sm:$0xff] }
  0x12   :  { %256 = vperm.xlu1 %712, %v218_v15   ;;  %677 = vmatprep.mubr.msk.f32.mxu1 %vm259_vm2, %v203_v26  ;;  %v207_v57 = vld [vmem:[%s922_s3 + $0x20] sm:$0xff]  ;;  %p721_p4 = pnand %p720_p3, %p714_p0 }
  0x13   :  { %v401_v61 = vld [vmem:[%s924_s5] sm:$0xff] }
  0x14   :  { %231 = vperm.xlu0 %711, %v213_v16   ;;  %697 = vmatprep.mubr.msk.f32.mxu0 %vm415_vm3, %v401_v61 }
  0x16   :  { %251 = vperm.xlu1 %712, %v217_v17  }
  0x18   :  { %226 = vperm.xlu0 %711, %v212_v18  }
  0x1a   :  { %246 = vperm.xlu1 %712, %v216_v19  }
  0x1c   :  { %221 = vperm.xlu0 %711, %v211_v20  }
  0x1e   :  { %241 = vperm.xlu1 %712, %v215_v21  }
  0x20   :  { %412 = vperm.xlu0 %711, %v404_v22  }
  0x22   :  { %407 = vperm.xlu1 %712, %v403_v23  }
  0x24   :  { %505 = vperm.xlu0 %711, %v501_v24  }
  0x26   :  { %510 = vperm.xlu1 %712, %v502_v25  }
  0x7f   :  { %v59_v28 = vpop.permute.xlu0 %58 }
  0x80   :  { %v54_v27 = vpop.permute.xlu1 %53 }
  0x83   :  { %v74_v32 = vpop.permute.xlu0 %73 }
  0x85   :  { %v69_v30 = vpop.permute.xlu1 %68 }
  0x87   :  { %v49_v41 = vpop.permute.xlu0 %48 }
  0x89   :  { %v64_v36 = vpop.permute.xlu1 %63 }
  0x8b   :  { %v237_v63 = vpop.permute.xlu0 %236 }
  0x8d   :  { %v257_v62 = vpop.permute.xlu1 %256 }
  0x8f   :  { %v232_v3 = vpop.permute.xlu0 %231 }
  0x91   :  { %v252_v1 = vpop.permute.xlu1 %251 }
  0x93   :  { %v227_v8 = vpop.permute.xlu0 %226 }
  0x95   :  { %v247_v6 = vpop.permute.xlu1 %246 }
  0x97   :  { %v222_v18 = vpop.permute.xlu0 %221 }
  0x99   :  { %v242_v15 = vpop.permute.xlu1 %241 }
  0xc4   :  { %v664_v29 = vpop.f32.mrf.mxu0 }
  0xc5   :  { %v171_v38 = vadd.f32 %v664_v29, %v54_v27 }
  0xc6   :  { %v165_v31 = vpop.f32.mrf.mxu0 }
  0xc7   :  { %v166_v43 = vadd.f32 %v165_v31, %v49_v41  ;;  %v195_v47 = vmax.f32 %v171_v38, 0.0 }
  0xc8   :  { %v667_v33 = vpop.f32.mrf.mxu0 }
  0xc9   :  { %v181_v39 = vadd.f32 %v667_v33, %v64_v36  ;;  %v194_v51 = vmax.f32 %v166_v43, 0.0  ;;  %v413_v36 = vpop.permute.xlu0 %412 }
  0xca   :  { %v175_v34 = vpop.f32.mrf.mxu0 }
  0xcb   :  { %v176_v35 = vadd.f32 %v175_v34, %v59_v28  ;;  %v197_v48 = vmax.f32 %v181_v39, 0.0  ;;  %v402_v34 = vld [vmem:[%s924_s5 + $0x8] sm:$0xff]  ;;  %v408_v39 = vpop.permute.xlu1 %407 }
  0xcc   :  { %v670_v37 = vpop.f32.mrf.mxu0 }
  0xcd   :  { %v191_v40 = vadd.f32 %v670_v37, %v74_v32  ;;  %v196_v44 = vmax.f32 %v176_v35, 0.0  ;;  %v200_v53 = vmax.f32 %v194_v51, %v197_v48  ;;  %v499_v35 = vld [vmem:[%s926_s7] sm:$0xff]  ;;  %v506_v48 = vpop.permute.xlu0 %505 }
  0xce   :  { %v185_v42 = vpop.f32.mrf.mxu0 }
  0xcf   :  { %v199_v45 = vmax.f32 %v191_v40, 0.0  ;;  %v186_v46 = vadd.f32 %v185_v42, %v69_v30 }
  0xd1   :  { %v198_v49 = vmax.f32 %v186_v46, 0.0  ;;  %v202_v50 = vmax.f32 %v196_v44, %v199_v45  ;;  %v500_v44 = vld [vmem:[%s926_s7 + $0x8] sm:$0x7]  ;;  %v511_v45 = vpop.permute.xlu1 %510 }
  0xd3   :  { %v201_v52 = vmax.f32 %v195_v47, %v198_v49  ;;  %671 = vmatprep.subr.mxu1 %v202_v50 }
  0xd4   :  { %672 = vmatpush3.msra.mxu1 %v202_v50 }
  0xd5   :  { %673 = vmatprep.subr.mxu1 %v201_v52 }
  0xd6   :  { %674 = vmatpush3.msra.mxu1 %v201_v52 }
  0xd7   :  { %675 = vmatprep.subr.mxu1 %v200_v53 }
  0xd8   :  { %676 = vmatpush3.msra.mxu1 %v200_v53 }
  0xd9   :  { %678 = vmatmul.mubr.msk.f32.vlgmr.msra.gmra.mxu1 %vm259_vm2, %v204_v54 }
  0xda   :  { %680 = vmatprep.mubr.msk.f32.mxu1 %vm259_vm2, %v205_v55 }
  0xdd   :  { %681 = vmatmul.mubr.msk.f32.gmra.mxu1 %vm259_vm2, %v206_v56 }
  0xde   :  { %683 = vmatprep.mubr.msk.f32.mxu1 %vm259_vm2, %v207_v57 }
  0xe1   :  { %684 = vmatmul.mubr.msk.f32.gmra.mxu1 %vm259_vm2, %v208_v58 }
  0xe2   :  { %686 = vmatprep.mubr.msk.f32.mxu1 %vm259_vm2, %v209_v59 }
  0xe5   :  { %687 = vmatmul.mubr.msk.f32.gmra.mxu1 %vm259_vm2, %v210_v60 }
 0x199   :  { %v679_v0 = vpop.f32.mrf.mxu1 }
 0x19a   :  { %v356_v16 = vadd.f32 %v679_v0, %v227_v8 }
 0x19b   :  { %v350_v2 = vpop.f32.mrf.mxu1 }
 0x19c   :  { %v351_v23 = vadd.f32 %v350_v2, %v222_v18  ;;  %v390_v28 = vmax.f32 %v356_v16, 0.0 }
 0x19d   :  { %v682_v4 = vpop.f32.mrf.mxu1 }
 0x19e   :  { %v366_v10 = vadd.f32 %v682_v4, %v237_v63  ;;  %v389_v31 = vmax.f32 %v351_v23, 0.0 }
 0x19f   :  { %v360_v5 = vpop.f32.mrf.mxu1 }
 0x1a0   :  { %v361_v12 = vadd.f32 %v360_v5, %v232_v3  ;;  %v392_v19 = vmax.f32 %v366_v10, 0.0 }
 0x1a1   :  { %v685_v7 = vpop.f32.mrf.mxu1 }
 0x1a2   :  { %v376_v13 = vadd.f32 %v685_v7, %v247_v6  ;;  %v391_v24 = vmax.f32 %v361_v12, 0.0 }
 0x1a3   :  { %v370_v9 = vpop.f32.mrf.mxu1 }
 0x1a4   :  { %v371_v20 = vadd.f32 %v370_v9, %v242_v15  ;;  %v394_v25 = vmax.f32 %v376_v13, 0.0 }
 0x1a5   :  { %v688_v11 = vpop.f32.mrf.mxu1 }
 0x1a6   :  { %v386_v14 = vadd.f32 %v688_v11, %v257_v62  ;;  %v393_v29 = vmax.f32 %v371_v20, 0.0  ;;  %v398_v32 = vmax.f32 %v390_v28, %v394_v25 }
 0x1a7   :  { %v380_v17 = vpop.f32.mrf.mxu1 }
 0x1a8   :  { %v396_v21 = vmax.f32 %v386_v14, 0.0  ;;  %v381_v22 = vadd.f32 %v380_v17, %v252_v1  ;;  %v397_v33 = vmax.f32 %v389_v31, %v393_v29 }
 0x1aa   :  { %v400_v26 = vmax.f32 %v392_v19, %v396_v21  ;;  %v395_v27 = vmax.f32 %v381_v22, 0.0 }
 0x1ac   :  { %v399_v30 = vmax.f32 %v391_v24, %v395_v27  ;;  %689 = vmatprep.subr.mxu0 %v400_v26 }
 0x1ad   :  { %690 = vmatpush3.msra.mxu0 %v400_v26 }
 0x1ae   :  { %691 = vmatprep.subr.mxu0 %v399_v30 }
 0x1af   :  { %692 = vmatpush3.msra.mxu0 %v399_v30 }
 0x1b0   :  { %693 = vmatprep.subr.mxu0 %v398_v32 }
 0x1b1   :  { %694 = vmatpush3.msra.mxu0 %v398_v32 }
 0x1b2   :  { %695 = vmatprep.subr.mxu0 %v397_v33 }
 0x1b3   :  { %696 = vmatpush3.msra.mxu0 %v397_v33 }
 0x1b4   :  { %698 = vmatmul.mubr.msk.f32.vlgmr.msra.gmra.mxu0 %vm415_vm3, %v402_v34 }
 0x1b5   :  { %704 = vmatprep.mubr.msk.f32.mxu0 %vm513_vm4, %v499_v35 }
 0x274   :  { %v699_v37 = vpop.f32.mrf.mxu0 }
 0x275   :  { %v494_v38 = vadd.f32 %v699_v37, %v413_v36 }
 0x276   :  { %v488_v40 = vpop.f32.mrf.mxu0 }
 0x277   :  { %v498_v41 = vmax.f32 %v494_v38, 0.0  ;;  %v489_v42 = vadd.f32 %v488_v40, %v408_v39 }
 0x279   :  { %v497_v43 = vmax.f32 %v489_v42, 0.0  ;;  %700 = vmatprep.subr.mxu0 %v498_v41 }
 0x27a   :  { %701 = vmatpush3.msra.mxu0 %v498_v41 }
 0x27b   :  { %702 = vmatprep.subr.mxu0 %v497_v43 }
 0x27c   :  { %703 = vmatpush3.msra.mxu0 %v497_v43 }
 0x27d   :  { %705 = vmatmul.mubr.msk.f32.vlgmr.msra.gmra.mxu0 %vm513_vm4, %v500_v44 }
 0x33d   :  { %v706_v46 = vpop.f32.mrf.mxu0 }
 0x33e   :  { %v592_v47 = vadd.f32 %v706_v46, %v511_v45 }
 0x33f   :  { %v586_v49 = vpop.f32.mrf.mxu0 }
 0x340   :  { %596 = vst [vmem:[#allocation2 + $0x8] sm:$0x7] %v592_v47  ;;  %v587_v50 = vadd.f32 %v586_v49, %v506_v48 }
 0x342   :  { %595 = vst [vmem:[#allocation2] sm:$0xff] %v587_v50 }
 0x343   :  { %724 = shalt.err (!%p721_p4)
}
 0x344   :  { %s737_s7 = smov 128   ;;  %s738_s11 = smov 8  }
 0x345   :  { %608 = dma.vmem_to_hbm [thread:$0]  %s603_s30, 256, %s928_s9, [#allocation3], %s737_s7, %s737_s7, %s738_s11  }
 0x346   :  { %733 = dma.done.wait [#allocation3], 256  }
 0x347   :  { %734 = vsyncadd [#allocation3], 4294967040 }
 0x348   :  { %612 = vsyncpa [#allocation3], 1 }

</bundles_post_ra>
